<compile_context>
chip_gen: v6e
topology: v6e:2x2x1
jax: 0.10.0
libtpu: 0.0.40
codegen_flags: <defaults>
</compile_context>

<pallas_src>
import functools

import jax
import jax.numpy as jnp
from jax.experimental import pallas as pl
from jax.experimental.pallas import tpu as pltpu


def _bev_extract_kernel(centers_ref, bev_ref, out_ref, acc_ref, *,
                        pc_start, voxel_size, out_stride,
                        H, W, tile_h, num_point):
    # centers_ref: (N, D)          absolute centers for one batch element
    # bev_ref:     (tile_h, W, C)  one row-slab of the BEV map (compute dtype)
    # out_ref:     (s, P*C) or (N, C)   interleaved output (float32)
    # acc_ref:     (N, C) float32  accumulator across the H-tile axis
    k = pl.program_id(1)
    n_k = pl.num_programs(1)
    N = centers_ref.shape[0]
    C = bev_ref.shape[-1]
    K = tile_h * W

    @pl.when(k == 0)
    def _init():
        acc_ref[...] = jnp.zeros_like(acc_ref)

    # absl_to_relative
    xs = (centers_ref[:, 0:1] - pc_start[0]) / voxel_size[0] / out_stride  # (N,1) col
    ys = (centers_ref[:, 1:2] - pc_start[1]) / voxel_size[1] / out_stride  # (N,1) row

    x0f = jnp.floor(xs)
    y0f = jnp.floor(ys)
    x0c = jnp.clip(x0f, 0.0, float(W - 1))
    x1c = jnp.clip(x0f + 1.0, 0.0, float(W - 1))
    y0c = jnp.clip(y0f, 0.0, float(H - 1))
    y1c = jnp.clip(y0f + 1.0, 0.0, float(H - 1))
    x0i = x0c.astype(jnp.int32)
    x1i = x1c.astype(jnp.int32)
    y0i = y0c.astype(jnp.int32)
    y1i = y1c.astype(jnp.int32)

    # Separable two-hot weights (integer iota + integer compares).
    col = jax.lax.broadcasted_iota(jnp.int32, (N, W), 1)                    # (N, W)
    wx = (jnp.where(col == x0i, x1c - xs, 0.0)
          + jnp.where(col == x1i, xs - x0c, 0.0))                           # (N, W)

    row = jax.lax.broadcasted_iota(jnp.int32, (N, tile_h), 1) + k * tile_h  # (N, T_H)
    wy = (jnp.where(row == y0i, y1c - ys, 0.0)
          + jnp.where(row == y1i, ys - y0c, 0.0))                           # (N, T_H)

    # Outer product -> (N, T_H*W) weight tile; rows past H (padding) get 0 weight.
    weights = (wy[:, :, None] * wx[:, None, :]).reshape(N, K)

    bev = bev_ref[...].reshape(K, C)
    acc_ref[...] += jnp.dot(weights.astype(bev.dtype), bev,
                            preferred_element_type=jnp.float32)

    @pl.when(k == n_k - 1)
    def _finalize():
        if num_point > 1:
            s = N // num_point
            parts = [acc_ref[p * s:(p + 1) * s, :] for p in range(num_point)]
            out_ref[...] = jnp.concatenate(parts, axis=-1).astype(out_ref.dtype)
        else:
            out_ref[...] = acc_ref[...].astype(out_ref.dtype)


class BEVFeatureExtractor:
    def __init__(self, pc_start, voxel_size, out_stride, num_point,
                 compute_dtype=jnp.bfloat16, tile_h=None):
        self.pc_start = tuple(float(v) for v in pc_start)
        self.voxel_size = tuple(float(v) for v in voxel_size)
        self.out_stride = float(out_stride)
        self.num_point = int(num_point)
        self.compute_dtype = compute_dtype
        self.tile_h = tile_h

    def _choose_tile_h(self, H, W, C, N):
        if self.tile_h is not None:
            return max(1, min(int(self.tile_h), H))
        elt = jnp.dtype(self.compute_dtype).itemsize
        budget = 4 * (1 << 20)  # ~4 MiB per bev slab / weight tile (v7x-safe)
        t = min(H,
                max(1, budget // max(1, W * C * elt)),
                max(1, budget // max(1, N * W * elt)))
        if t >= 8:
            t = (t // 8) * 8
        return max(1, t)

    def __call__(self, bev_features, batch_centers):
        # bev_features:  (B, H, W, C) float32 (cast to compute dtype internally)
        # batch_centers: (B, N, D>=2) float32
        B, H, W, C = bev_features.shape
        _, N, D = batch_centers.shape
        P = self.num_point

        tile_h = self._choose_tile_h(H, W, C, N)
        n_k = pl.cdiv(H, tile_h)
        H_pad = n_k * tile_h

        bev = bev_features.astype(self.compute_dtype)
        if H_pad != H:
            bev = jnp.pad(bev, ((0, 0), (0, H_pad - H), (0, 0), (0, 0)))
        centers = batch_centers.astype(jnp.float32)

        if P > 1:
            s = N // P
            out_shape = (B, s, P * C)
        else:
            s = N
            out_shape = (B, N, C)

        elt = jnp.dtype(self.compute_dtype).itemsize
        # VMEM budget: double-buffered inputs/outputs + accumulator + weight temps.
        tile_bytes = (2 * tile_h * W * C * elt          # bev slab (x2 buffers)
                      + 2 * N * D * 4                   # centers (x2 buffers)
                      + 2 * out_shape[1] * out_shape[2] * 4  # out block (x2)
                      + N * C * 4                       # accumulator scratch
                      + N * tile_h * W * (4 + elt))     # weight intermediates
        vmem_limit = int(min(max(2 * tile_bytes, 32 * (1 << 20)), 64 * (1 << 20)))

        cost = pl.CostEstimate(
            flops=2 * B * N * H_pad * W * C,
            transcendentals=0,
            bytes_accessed=B * (H_pad * W * C * elt + N * D * 4
                                + out_shape[1] * out_shape[2] * 4))

        kernel = functools.partial(
            _bev_extract_kernel,
            pc_start=self.pc_start, voxel_size=self.voxel_size,
            out_stride=self.out_stride, H=H, W=W, tile_h=tile_h, num_point=P)

        out = pl.pallas_call(
            kernel,
            out_shape=jax.ShapeDtypeStruct(out_shape, jnp.float32),
            grid=(B, n_k),
            in_specs=[
                pl.BlockSpec((None, N, D), lambda b, k: (b, 0, 0)),         # centers
                pl.BlockSpec((None, tile_h, W, C), lambda b, k: (b, k, 0, 0)),  # bev slab
            ],
            out_specs=pl.BlockSpec((None,) + out_shape[1:],
                                   lambda b, k: (b, 0, 0)),
            scratch_shapes=[pltpu.VMEM((N, C), jnp.float32)],
            compiler_params=pltpu.CompilerParams(
                dimension_semantics=("parallel", "arbitrary"),
                vmem_limit_bytes=vmem_limit),
            cost_estimate=cost,
        )(centers, bev)
        return out


def _reference(bev, centers, pc_start, voxel_size, out_stride, num_point):
    """Pure-JAX port of the PyTorch forward (for correctness check)."""
    B, H, W, C = bev.shape
    outs = []
    for b in range(B):
        xs = (centers[b, :, 0] - pc_start[0]) / voxel_size[0] / out_stride
        ys = (centers[b, :, 1] - pc_start[1]) / voxel_size[1] / out_stride
        x0 = jnp.clip(jnp.floor(xs).astype(jnp.int32), 0, W - 1)
        x1 = jnp.clip(jnp.floor(xs).astype(jnp.int32) + 1, 0, W - 1)
        y0 = jnp.clip(jnp.floor(ys).astype(jnp.int32), 0, H - 1)
        y1 = jnp.clip(jnp.floor(ys).astype(jnp.int32) + 1, 0, H - 1)
        im = bev[b]
        Ia, Ib = im[y0, x0], im[y1, x0]
        Ic, Id = im[y0, x1], im[y1, x1]
        wa = (x1.astype(xs.dtype) - xs) * (y1.astype(ys.dtype) - ys)
        wb = (x1.astype(xs.dtype) - xs) * (ys - y0.astype(ys.dtype))
        wc = (xs - x0.astype(xs.dtype)) * (y1.astype(ys.dtype) - ys)
        wd = (xs - x0.astype(xs.dtype)) * (ys - y0.astype(ys.dtype))
        fm = (Ia * wa[:, None] + Ib * wb[:, None]
              + Ic * wc[:, None] + Id * wd[:, None])
        if num_point > 1:
            s = fm.shape[0] // num_point
            fm = jnp.concatenate(
                [fm[i * s:(i + 1) * s] for i in range(num_point)], axis=1)
        outs.append(fm)
    return jnp.stack(outs)


if __name__ == "__main__":
    key = jax.random.PRNGKey(0)
    B, H, W, C = 2, 16, 16, 128            # num_point*C = 256 -> lane-dense output
    num_point, num_rois = 2, 8
    N = num_point * num_rois

    pc_start = (-8.0, -8.0)
    voxel_size = (0.5, 0.5)
    out_stride = 2

    k_bev, k_xy, k_z = jax.random.split(key, 3)
    bev_features = jax.random.normal(k_bev, (B, H, W, C), dtype=jnp.float32)
    # absolute xy centers (some slightly out of bounds to exercise clamping)
    xy = jax.random.uniform(k_xy, (B, N, 2), minval=-9.0, maxval=8.5,
                            dtype=jnp.float32)
    z = jax.random.normal(k_z, (B, N, 1), dtype=jnp.float32)
    batch_centers = jnp.concatenate([xy, z], axis=-1)

    ref = _reference(bev_features, batch_centers, pc_start, voxel_size,
                     out_stride, num_point)

    # f32 compute path: bit-faithful to the reference (tight tolerance).
    # tile_h=8 -> two reduction steps, exercising the accumulator pipeline.
    extractor_f32 = BEVFeatureExtractor(pc_start, voxel_size, out_stride,
                                        num_point, compute_dtype=jnp.float32,
                                        tile_h=8)
    out_f32 = jax.block_until_ready(extractor_f32(bev_features, batch_centers))
    assert out_f32.shape == ref.shape, (out_f32.shape, ref.shape)
    err_f32 = float(jnp.max(jnp.abs(out_f32 - ref)))
    assert err_f32 < 1e-3, err_f32

    # bf16 compute path (default, MXU-native): looser tolerance from bf16
    # quantization of the BEV features and bilinear weights (f32 accumulate).
    extractor_bf16 = BEVFeatureExtractor(pc_start, voxel_size, out_stride,
                                         num_point, compute_dtype=jnp.bfloat16,
                                         tile_h=8)
    out_bf16 = jax.block_until_ready(extractor_bf16(bev_features, batch_centers))
    assert out_bf16.shape == ref.shape, (out_bf16.shape, ref.shape)
    err_bf16 = float(jnp.max(jnp.abs(out_bf16 - ref)))
    assert err_bf16 < 1e-1, err_bf16

    print("KERNEL_OK")
</pallas_src>

<mosaic_0001>
module attributes {stable_mosaic.version = 11 : i64} {
  func.func @_bev_extract_kernel(%arg0: i32, %arg1: i32, %arg2: memref<1x16x3xf32, #tpu.memory_space<vmem>>, %arg3: memref<1x8x16x128xf32, #tpu.memory_space<vmem>>, %arg4: memref<1x8x256xf32, #tpu.memory_space<vmem>>, %arg5: memref<16x128xf32, #tpu.memory_space<vmem>>) attributes {dimension_semantics = [#tpu.dimension_semantics<parallel>, #tpu.dimension_semantics<arbitrary>], iteration_bounds = array<i64: 2, 2>, scalar_prefetch = 0 : i64, scratch_operands = 1 : i64, tpu.core_type = #tpu.core_type<tc>, window_params = [{transform_indices = @transform_0, window_bounds = array<i64: 1, 16, 3>}, {transform_indices = @transform_1, window_bounds = array<i64: 1, 8, 16, 128>}, {transform_indices = @transform_2, window_bounds = array<i64: 1, 8, 256>}]} {
    %c0_i32 = arith.constant 0 : i32
    %0 = arith.cmpi eq, %arg1, %c0_i32 : i32
    %1 = arith.extui %0 : i1 to i32
    %c0_i32_0 = arith.constant 0 : i32
    %2 = arith.cmpi ne, %1, %c0_i32_0 : i32
    scf.if %2 {
      %cst_34 = arith.constant 0.000000e+00 : f32
      %96 = vector.broadcast %cst_34 : f32 to vector<16x128xf32>
      %c0_35 = arith.constant 0 : index
      %c0_36 = arith.constant 0 : index
      %97 = vector.load %arg5[%c0_35, %c0_36] : memref<16x128xf32, #tpu.memory_space<vmem>>, vector<16x128xf32>
      tpu.vector_store %arg5[%c0_35, %c0_36], %96 {strides = array<i32>} : memref<16x128xf32, #tpu.memory_space<vmem>>, vector<16x128xf32>,
    } else {
    }
    %c0 = arith.constant 0 : index
    %c0_1 = arith.constant 0 : index
    %c0_2 = arith.constant 0 : index
    %3 = vector.load %arg2[%c0, %c0_1, %c0_2] : memref<1x16x3xf32, #tpu.memory_space<vmem>>, vector<1x16x1xf32>
    %4 = vector.shape_cast %3 : vector<1x16x1xf32> to vector<16x1xf32>
    %cst = arith.constant -8.000000e+00 : f32
    %5 = vector.broadcast %cst : f32 to vector<16x1xf32>
    %6 = arith.subf %4, %5 : vector<16x1xf32>
    %cst_3 = arith.constant 5.000000e-01 : f32
    %7 = vector.broadcast %cst_3 : f32 to vector<16x1xf32>
    %8 = arith.divf %6, %7 : vector<16x1xf32>
    %cst_4 = arith.constant 2.000000e+00 : f32
    %9 = vector.broadcast %cst_4 : f32 to vector<16x1xf32>
    %10 = arith.divf %8, %9 : vector<16x1xf32>
    %c0_5 = arith.constant 0 : index
    %c0_6 = arith.constant 0 : index
    %c1 = arith.constant 1 : index
    %11 = vector.load %arg2[%c0_5, %c0_6, %c1] : memref<1x16x3xf32, #tpu.memory_space<vmem>>, vector<1x16x1xf32>
    %12 = vector.shape_cast %11 : vector<1x16x1xf32> to vector<16x1xf32>
    %cst_7 = arith.constant -8.000000e+00 : f32
    %13 = vector.broadcast %cst_7 : f32 to vector<16x1xf32>
    %14 = arith.subf %12, %13 : vector<16x1xf32>
    %cst_8 = arith.constant 5.000000e-01 : f32
    %15 = vector.broadcast %cst_8 : f32 to vector<16x1xf32>
    %16 = arith.divf %14, %15 : vector<16x1xf32>
    %cst_9 = arith.constant 2.000000e+00 : f32
    %17 = vector.broadcast %cst_9 : f32 to vector<16x1xf32>
    %18 = arith.divf %16, %17 : vector<16x1xf32>
    %19 = math.floor %10 : vector<16x1xf32>
    %20 = math.floor %18 : vector<16x1xf32>
    %cst_10 = arith.constant 0.000000e+00 : f32
    %cst_11 = arith.constant 1.500000e+01 : f32
    %21 = vector.broadcast %cst_10 : f32 to vector<16x1xf32>
    %22 = arith.maximumf %21, %19 : vector<16x1xf32>
    %23 = vector.broadcast %cst_11 : f32 to vector<16x1xf32>
    %24 = arith.minimumf %23, %22 : vector<16x1xf32>
    %cst_12 = arith.constant 1.000000e+00 : f32
    %25 = vector.broadcast %cst_12 : f32 to vector<16x1xf32>
    %26 = arith.addf %19, %25 : vector<16x1xf32>
    %cst_13 = arith.constant 0.000000e+00 : f32
    %cst_14 = arith.constant 1.500000e+01 : f32
    %27 = vector.broadcast %cst_13 : f32 to vector<16x1xf32>
    %28 = arith.maximumf %27, %26 : vector<16x1xf32>
    %29 = vector.broadcast %cst_14 : f32 to vector<16x1xf32>
    %30 = arith.minimumf %29, %28 : vector<16x1xf32>
    %cst_15 = arith.constant 0.000000e+00 : f32
    %cst_16 = arith.constant 1.500000e+01 : f32
    %31 = vector.broadcast %cst_15 : f32 to vector<16x1xf32>
    %32 = arith.maximumf %31, %20 : vector<16x1xf32>
    %33 = vector.broadcast %cst_16 : f32 to vector<16x1xf32>
    %34 = arith.minimumf %33, %32 : vector<16x1xf32>
    %cst_17 = arith.constant 1.000000e+00 : f32
    %35 = vector.broadcast %cst_17 : f32 to vector<16x1xf32>
    %36 = arith.addf %20, %35 : vector<16x1xf32>
    %cst_18 = arith.constant 0.000000e+00 : f32
    %cst_19 = arith.constant 1.500000e+01 : f32
    %37 = vector.broadcast %cst_18 : f32 to vector<16x1xf32>
    %38 = arith.maximumf %37, %36 : vector<16x1xf32>
    %39 = vector.broadcast %cst_19 : f32 to vector<16x1xf32>
    %40 = arith.minimumf %39, %38 : vector<16x1xf32>
    %41 = arith.fptosi %24 : vector<16x1xf32> to vector<16x1xi32>
    %42 = arith.fptosi %30 : vector<16x1xf32> to vector<16x1xi32>
    %43 = arith.fptosi %34 : vector<16x1xf32> to vector<16x1xi32>
    %44 = arith.fptosi %40 : vector<16x1xf32> to vector<16x1xi32>
    %45 = tpu.iota {dimensions = array<i32: 1>} : vector<16x16xi32>
    %46 = vector.broadcast %41 : vector<16x1xi32> to vector<16x16xi32>
    %47 = arith.cmpi eq, %45, %46 : vector<16x16xi32>
    %48 = arith.subf %30, %10 : vector<16x1xf32>
    %cst_20 = arith.constant 0.000000e+00 : f32
    %49 = vector.shape_cast %48 : vector<16x1xf32> to vector<16x1xf32>
    %50 = vector.broadcast %49 : vector<16x1xf32> to vector<16x16xf32>
    %51 = vector.broadcast %cst_20 : f32 to vector<16x16xf32>
    %52 = arith.select %47, %50, %51 : vector<16x16xi1>, vector<16x16xf32>
    %53 = vector.broadcast %42 : vector<16x1xi32> to vector<16x16xi32>
    %54 = arith.cmpi eq, %45, %53 : vector<16x16xi32>
    %55 = arith.subf %10, %24 : vector<16x1xf32>
    %cst_21 = arith.constant 0.000000e+00 : f32
    %56 = vector.shape_cast %55 : vector<16x1xf32> to vector<16x1xf32>
    %57 = vector.broadcast %56 : vector<16x1xf32> to vector<16x16xf32>
    %58 = vector.broadcast %cst_21 : f32 to vector<16x16xf32>
    %59 = arith.select %54, %57, %58 : vector<16x16xi1>, vector<16x16xf32>
    %60 = arith.addf %52, %59 : vector<16x16xf32>
    %61 = tpu.iota {dimensions = array<i32: 1>} : vector<16x8xi32>
    %c8_i32 = arith.constant 8 : i32
    %62 = arith.muli %arg1, %c8_i32 : i32
    %63 = vector.broadcast %62 : i32 to vector<16x8xi32>
    %64 = arith.addi %61, %63 : vector<16x8xi32>
    %65 = vector.broadcast %43 : vector<16x1xi32> to vector<16x8xi32>
    %66 = arith.cmpi eq, %64, %65 : vector<16x8xi32>
    %67 = arith.subf %40, %18 : vector<16x1xf32>
    %cst_22 = arith.constant 0.000000e+00 : f32
    %68 = vector.shape_cast %67 : vector<16x1xf32> to vector<16x1xf32>
    %69 = vector.broadcast %68 : vector<16x1xf32> to vector<16x8xf32>
    %70 = vector.broadcast %cst_22 : f32 to vector<16x8xf32>
    %71 = arith.select %66, %69, %70 : vector<16x8xi1>, vector<16x8xf32>
    %72 = vector.broadcast %44 : vector<16x1xi32> to vector<16x8xi32>
    %73 = arith.cmpi eq, %64, %72 : vector<16x8xi32>
    %74 = arith.subf %18, %34 : vector<16x1xf32>
    %cst_23 = arith.constant 0.000000e+00 : f32
    %75 = vector.shape_cast %74 : vector<16x1xf32> to vector<16x1xf32>
    %76 = vector.broadcast %75 : vector<16x1xf32> to vector<16x8xf32>
    %77 = vector.broadcast %cst_23 : f32 to vector<16x8xf32>
    %78 = arith.select %73, %76, %77 : vector<16x8xi1>, vector<16x8xf32>
    %79 = arith.addf %71, %78 : vector<16x8xf32>
    %80 = vector.shape_cast %79 : vector<16x8xf32> to vector<16x8x1xf32>
    %81 = vector.shape_cast %60 : vector<16x16xf32> to vector<16x1x16xf32>
    %82 = vector.broadcast %80 : vector<16x8x1xf32> to vector<16x8x16xf32>
    %83 = vector.broadcast %81 : vector<16x1x16xf32> to vector<16x8x16xf32>
    %84 = arith.mulf %82, %83 : vector<16x8x16xf32>
    %85 = vector.shape_cast %84 : vector<16x8x16xf32> to vector<16x128xf32>
    %c0_24 = arith.constant 0 : index
    %c0_25 = arith.constant 0 : index
    %c0_26 = arith.constant 0 : index
    %c0_27 = arith.constant 0 : index
    %86 = vector.load %arg3[%c0_24, %c0_25, %c0_26, %c0_27] : memref<1x8x16x128xf32, #tpu.memory_space<vmem>>, vector<1x8x16x128xf32>
    %87 = vector.shape_cast %86 : vector<1x8x16x128xf32> to vector<8x16x128xf32>
    %88 = vector.shape_cast %87 : vector<8x16x128xf32> to vector<128x128xf32>
    %c0_28 = arith.constant 0 : index
    %c0_29 = arith.constant 0 : index
    %89 = vector.load %arg5[%c0_28, %c0_29] : memref<16x128xf32, #tpu.memory_space<vmem>>, vector<16x128xf32>
    %cst_30 = arith.constant dense<0.000000e+00> : vector<16x128xf32>
    %90 = tpu.matmul %85, %88, %cst_30 {dimension_numbers = #tpu.dot_dimension_numbers<[1], [0], [0], [1], [0, 0, 1, 1], [], []>} : vector<16x128xf32>, vector<128x128xf32>, vector<16x128xf32> -> vector<16x128xf32>
    %91 = arith.addf %89, %90 : vector<16x128xf32>
    %c0_31 = arith.constant 0 : index
    %c0_32 = arith.constant 0 : index
    %92 = vector.load %arg5[%c0_31, %c0_32] : memref<16x128xf32, #tpu.memory_space<vmem>>, vector<16x128xf32>
    tpu.vector_store %arg5[%c0_31, %c0_32], %91 {strides = array<i32>} : memref<16x128xf32, #tpu.memory_space<vmem>>, vector<16x128xf32>,
    %c1_i32 = arith.constant 1 : i32
    %93 = arith.cmpi eq, %arg1, %c1_i32 : i32
    %94 = arith.extui %93 : i1 to i32
    %c0_i32_33 = arith.constant 0 : i32
    %95 = arith.cmpi ne, %94, %c0_i32_33 : i32
    scf.if %95 {
      %c0_34 = arith.constant 0 : index
      %c0_35 = arith.constant 0 : index
      %96 = vector.load %arg5[%c0_34, %c0_35] : memref<16x128xf32, #tpu.memory_space<vmem>>, vector<8x128xf32>
      %c8 = arith.constant 8 : index
      %c0_36 = arith.constant 0 : index
      %97 = vector.load %arg5[%c8, %c0_36] : memref<16x128xf32, #tpu.memory_space<vmem>>, vector<8x128xf32>
      %98 = tpu.concatenate %96, %97 in 1 : vector<8x128xf32>, vector<8x128xf32> -> vector<8x256xf32>
      %c0_37 = arith.constant 0 : index
      %c0_38 = arith.constant 0 : index
      %c0_39 = arith.constant 0 : index
      %99 = vector.load %arg4[%c0_37, %c0_38, %c0_39] : memref<1x8x256xf32, #tpu.memory_space<vmem>>, vector<1x8x256xf32>
      %100 = vector.shape_cast %99 : vector<1x8x256xf32> to vector<8x256xf32>
      %101 = vector.shape_cast %98 : vector<8x256xf32> to vector<1x8x256xf32>
      tpu.vector_store %arg4[%c0_37, %c0_38, %c0_39], %101 {strides = array<i32>} : memref<1x8x256xf32, #tpu.memory_space<vmem>>, vector<1x8x256xf32>,
    } else {
    }
    return
  }
  func.func @transform_0(%arg0: i32, %arg1: i32) -> (i32, i32, i32) {
    %c0_i32 = arith.constant 0 : i32
    %c0_i32_0 = arith.constant 0 : i32
    %c0_i32_1 = arith.constant 0 : i32
    return %arg0, %c0_i32, %c0_i32_0 : i32, i32, i32
  }
  func.func @transform_1(%arg0: i32, %arg1: i32) -> (i32, i32, i32, i32) {
    %c0_i32 = arith.constant 0 : i32
    %c0_i32_0 = arith.constant 0 : i32
    %c0_i32_1 = arith.constant 0 : i32
    return %arg0, %arg1, %c0_i32, %c0_i32_0 : i32, i32, i32, i32
  }
  func.func @transform_2(%arg0: i32, %arg1: i32) -> (i32, i32, i32) {
    %c0_i32 = arith.constant 0 : i32
    %c0_i32_0 = arith.constant 0 : i32
    %c0_i32_1 = arith.constant 0 : i32
    return %arg0, %c0_i32, %c0_i32_0 : i32, i32, i32
  }
}

</mosaic_0001>

<bundles_post_ra>
// kernel: tpu_custom_call.1
= control target key start
LH: loop header
LB: loop body
LE: loop exit
PB: predicated region body
PF: predicated region fallthrough
CT: control target
= control target key end

     0   :  { %7 = vsyncpa [#allocation4], 0  ;;  %s2038_s0 = inlined_call_operand.vmem [shape: f32[2,16,3], index: 0, kind: input, shape index: {}]   ;;  %s2039_s1 = inlined_call_operand.hbm [shape: f32[2,16,16,128], index: 1, kind: input, shape index: {}]   ;;  %s2040_s2 = inlined_call_operand.hbm [shape: f32[2,8,256], index: 2, kind: output, shape index: {}]  }
   0x1   :  { %9 = vsyncpa [#allocation4 + $0x1], 0 }
   0x2   :  { %10 = vsyncpa [#allocation5], 0 }
   0x3   :  { %12 = vsyncpa [#allocation5 + $0x1], 0  ;;  %s1621_s9 = smov 0   ;;  %s1623_s10 = smov 0  }
   0x4   :  { %s1625_s11 = smov 0   ;;  %s1627_s12 = smov 0  }
   0x5   :  { %s1629_s13 = smov 0   ;;  %s1631_s14 = smov 0  }
   0x6   :  { %s1633_s15 = smov 0   ;;  %s1635_s16 = smov 0  }
   0x7   :  { %s1637_s17 = smov 0   ;;  %s1639_s18 = smov 0  }
   0x8   :  { %s1641_s19 = smov 0  }
   0x9 LB: > { %2044 = sst [smem:[#allocation9_spill]] %s1579_s17  ;;  %s1194_s20 = sadd.s32 4294967295, %s1587_s19   ;;  %s1587_s19 = sphi %s1641_s19, %s18_s19   ;;  %s1583_s18 = sphi %s1639_s18, %s2064_s18   ;;  %s1579_s17 = sphi %s1637_s17, %s2055_s17   ;;  %s1575_s16 = sphi %s1635_s16, %s2063_s16   ;;  %s1571_s15 = sphi %s1633_s15, %s2054_s15   ;;  %s1567_s14 = sphi %s1631_s14, %s2062_s14   ;;  %s1563_s13 = sphi %s1629_s13, %s2061_s13   ;;  %s1559_s12 = sphi %s1627_s12, %s2060_s12   ;;  %s1555_s11 = sphi %s1625_s11, %s2059_s11   ;;  %s1551_s10 = sphi %s1623_s10, %s2058_s10   ;;  %s1547_s9 = sphi %s1621_s9, %s2057_s9  }
   0xa   : > { %s1195_s21 = sadd.s32 4294967294, %s1587_s19   ;;  %s27_s22 = sadd.s32 1, %s1579_s17 }
   0xb   : > { %s30_s23 = sadd.s32 1, %s1583_s18  ;;  %p28_p0 = scmp.ge.s32.totalorder %s27_s22, 2 }
   0xc   : > { %s65_s24 = sadd.s32 1, %s1567_s14  ;;  %p72_p1 = scmp.ne.s32.totalorder %s1567_s14, %s1563_s13 }
   0xd   : > { %p73_p2 = scmp.eq.s32.totalorder %s1587_s19, 0  ;;  %s2066_s22 = smov (%p28_p0, %s27_s22), 0 }
   0xe   : > { %2045 = sst [smem:[#allocation10_spill]] %s2066_s22  ;;  %s2068_s23 = smov (!%p28_p0, %s30_s23), %s1583_s18 }
   0xf   : > { %s61_s25 = ssub.s32 %s1579_s17, %s2066_s22  ;;  %p1687_p3 = por %p73_p2, %p72_p1 }
  0x10   : > { %p32_p4 = scmp.ge.s32.totalorder %s2068_s23, 2  ;;  %p78_p5 = scmp.ne.s32.totalorder %s1563_s13, %s1559_s12 }
  0x11   : > { %p79_p6 = scmp.eq.s32.totalorder %s1194_s20, 0  ;;  %s91_s27 = sadd.s32 1, %s1555_s11 }
  0x12   : > { %s2070_s23 = smov (%p32_p4, %s2068_s23), 0  ;;  %p101_p8 = scmp.ne.s32.totalorder %s1555_s11, %s1551_s10 }
  0x13   : > { %2047 = sst [smem:[#allocation11_spill]] %s2070_s23  ;;  %p1695_p7 = por %p79_p6, %p78_p5 }
  0x14   : > { %s60_s29 = ssub.s32 %s1583_s18, %s2070_s23  ;;  %p102_p9 = scmp.eq.s32.totalorder %s1194_s20, 3 }
  0x15   : > { %s62_s30 = sor.u32 %s61_s25, %s60_s29  ;;  %p89_p10 = scmp.eq.s32.totalorder %s60_s29, 0 }
  0x16   : > { %p63_p11 = scmp.eq.s32.totalorder %s62_s30, 0  ;;  %p1703_p12 = por %p102_p9, %p101_p8 }
  0x17   : > { %s1708_s4 = scalar_select %p89_p10, %s1555_s11, %s91_s27  }
  0x18   : > { %s1711_s5 = scalar_select %p63_p11, %s1567_s14, %s65_s24  }
  0x19   : > { %p107_p13 = scmp.ne.s32.totalorder %s1551_s10, %s1547_s9  ;;  %p108_p0 = scmp.eq.s32.totalorder %s1195_s21, 3 }
  0x1a   : > { %2050 = sst [smem:[#allocation12_spill]] %s1711_s5  ;;  %p1294_p1 = scmp.lt.s32.totalorder %s1587_s19, 4 }
  0x1b   : > { %p1716_p2 = por %p108_p0, %p107_p13  ;;  %s136_s7 = sand.u32 1, %s1567_s14  }
  0x1c   : > { %s1198_s8 = sshll.u32 %s136_s7, 7  ;;  %s1218_s12 = sshll.u32 %s1579_s17, 4 }
  0x1d   : > { %s1201_s20 = sshll.u32 %s1583_s18, 5  ;;  %s140_s25 = scalar_lea.vmem [#allocation3], %s1198_s8 }
  0x1e   : > { %s150_s29 = sshll.u32 %s140_s25, 4  ;;  %s147_s30 = sadd.s32 %s1218_s12, %s1201_s20  ;;  %s151_s29 = int_to_ptr.vmem [resolvable:$true] %s150_s29 }
  0x1f   : > { %s1202_s23 = sshll.u32 %s147_s30, 7  ;;  %p1725_p4 = pnand %p1294_p1, %p1687_p3 }
  0x20   : > { %s149_s22 = scalar_lea.hbm %s2039_s1, %s1202_s23  ;;  %s137_s5 = scalar_lea.sflag [#allocation4], %s136_s7 }
  0x21   : > { %p1441_p5 = pneg %p1725_p4  ;;  %s1452_s17 = scalar_lea.vmem %s151_s29, 2048 }
  0x22   : > { %p1453_p6 = scmp.ne.s32.totalorder %s151_s29, %s1452_s17  ;;  %s1589_s8 = smov [#allocation3]  }
  0x23   : > { %s1457_s12 = sshll.u32 %s1589_s8, 4  ;;  %s1458_s12 = int_to_ptr.vmem [resolvable:$false] %s1457_s12 }
  0x24   : > { %p1455_p8 = pnand %p1453_p6, %p1441_p5  ;;  %s1459_s26 = scalar_lea.vmem %s1458_s12, 4096 }
  0x25   : > { %p1460_p3 = scmp.lt.s32.totalorder %s151_s29, %s1458_s12  ;;  %p1461_p10 = scmp.lt.s32.totalorder %s1459_s26, %s1452_s17 }
  0x26   : > { %p1456_p9 = pneg %p1455_p8 }
  0x27   : > { %p1462_p11 = por %p1461_p10, %p1460_p3 }
  0x29   : > { %p1463_p13 = pnand %p1462_p11, %p1456_p9 }
  0x2b   : > { %1466 = shalt.err (!%p1463_p13)
}
  0x2c   : > { %s1590_s20 = smov 128   ;;  %s1591_s23 = smov 8  }
  0x2d   : > { %1289 = dma.hbm_to_vmem [thread:$0]  (!%p1725_p4), %s149_s22, 2048, %s151_s29, %s137_s5, %s1590_s20, %s1590_s20, %s1591_s23  }
  0x2e   : > { %p1203_p0 = scmp.ge.s32.totalorder %s1587_s19, 1  ;;  %p158_p1 = scmp.lt.s32.totalorder %s1587_s19, 5 }
  0x30   : > { %p159_p5 = pnand %p1203_p0, %p158_p1 }
  0x31   : > { %s164_s7 = sand.u32 (!%p159_p5), 1, %s1563_s13  }
  0x32   : > { %162 = sbr.rel (%p159_p5) target bundleno = 735 (0x2df), region = 28  ;;  %s1204_s25 = sshll.u32 (!%p159_p5), %s164_s7, 7 }
  0x33   : > { %s165_s30 = scalar_lea.sflag (!%p159_p5), [#allocation4], %s164_s7  ;;  %s1739_s17 = scalar_lea.vmem (!%p159_p5), [#allocation3], %s1204_s25 }
  0x37   : > { %1538 = dma.done.wait (%p1695_p7), %s165_s30, 2048  }
  0x38   : > { %1540 = vsyncadd (%p1695_p7), %s165_s30, 4294965248  ;;  %s191_s22 = sand.u32 1, %s1551_s10   ;;  %p194_p4 = scmp.lt.s32.totalorder %s1575_s16, 1 }
  0x39   : > { %s1205_s5 = sshll.u32 %s191_s22, 4  ;;  %p1208_p6 = scmp.ne.s32.totalorder %s1571_s15, 0 }
  0x3a   : > { %s195_s29 = scalar_select %p194_p4, %s1575_s16, 1 }
  0x3b   : > { %s1753_s12 = scalar_lea.vmem [#allocation6], %s1205_s5  ;;  %203 = sbr.rel (%p1208_p6) target bundleno = 66 (0x42), region = 36 }
  0x3c   : > { %s1219_s24 = sshll.u32 %s195_s29, 4 }
  0x3d   : > { %s198_s8 = scalar_lea.vmem %s2038_s0, %s1219_s24 }
  0x40   : > { %v1592_v0 = vmov 0.0  }
  0x41   : > { %204 = vst [vmem:[#allocation2] sm:$0xff] %v1592_v0  ;;  %205 = vst [vmem:[#allocation2 + $0x8] sm:$0xff] %v1592_v0 }
  0x42 PF: > { %v206_v1 = vld [vmem:[%s198_s8] sm:$0xff]  ;;  %v207_v2 = vld [vmem:[%s198_s8 + $0x8] sm:$0xff]  ;;  %v1593_v3 = vmov 1   ;;  %v1594_v34 = vmov 0   ;;  %v232_v35 = vlaneseq  ;;  %s1211_s28 = sshll.u32 %s1571_s15, 3  ;;  %s1598_s26 = smov 32  }
  0x43   : > { %1399 = vset.pattern.permute.xlu1 %v1593_v3  ;;  %v1209_v4 = vadd.f32 8.0, %v206_v1  ;;  %1400 = vset.pattern.permute.xlu0 %v1593_v3  ;;  %v1210_v5 = vadd.f32 8.0, %v207_v2  ;;  %v281_v38 = vstv %s1211_s28  ;;  %v1595_v1 = vmov 1966171168   ;;  %s1599_s20 = smov 16   ;;  %s1600_s23 = smov 64  }
  0x44   : > { %v1757_v37 = vand.u32 127, %v232_v35  ;;  %v1760_v42 = vshrl.u32 %v232_v35, 7  ;;  %v437_v2 = vunpack.c.l.s4 %v1595_v1  ;;  %s1601_s7 = smov 48   ;;  %s1602_s25 = smov 96   ;;  %vm957_vm8 = vcmask 130048  }
  0x45   : > { %v211_v6 = vmul.f32 2.0, %v1209_v4  ;;  %v212_v7 = vmul.f32 2.0, %v1210_v5  ;;  %s1603_s30 = smov 80   ;;  %s1604_s5 = smov 112   ;;  %vm960_vm9 = vcmask 261120   ;;  %vm963_vm10 = vcmask 392192  }
  0x46   : > { %v282_v40 = vadd.s32 %v281_v38, %v1757_v37  ;;  %v1763_v46 = vsub.s32 0, %v1760_v42  ;;  %v330_v47 = vsub.s32 1, %v1760_v42  ;;  %v344_v53 = vsub.s32 3, %v1760_v42  ;;  %p1212_p7 = scmp.ne.s32.totalorder %s1571_s15, 1 }
  0x47   : > { %v214_v8 = vmul.f32 0.5, %v211_v6  ;;  %v215_v9 = vmul.f32 0.5, %v212_v7  ;;  %v337_v54 = vsub.s32 2, %v1760_v42  ;;  %v358_v57 = vsub.s32 5, %v1760_v42 }
  0x48   : > { %v351_v60 = vsub.s32 4, %v1760_v42  ;;  %v372_v62 = vsub.s32 7, %v1760_v42  ;;  %v365_v63 = vsub.s32 6, %v1760_v42  ;;  %vm966_vm11 = vcmask 523264  }
  0x49   : > { %v216_v10 = vfloor.f32 %v214_v8  ;;  %v217_v11 = vfloor.f32 %v215_v9  ;;  %vm969_vm12 = vcmask 654336   ;;  %vm972_vm13 = vcmask 785408  }
  0x4a   : > { %vm975_vm14 = vcmask 916480  }
  0x4b   : > { %v218_v12 = vmax.f32 %v216_v10, 0.0  ;;  %v219_v13 = vmax.f32 %v217_v11, 0.0  ;;  %v222_v14 = vadd.f32 1.0, %v216_v10  ;;  %v223_v15 = vadd.f32 1.0, %v217_v11 }
  0x4d   : > { %v220_v16 = vmin.f32 %v218_v12, 15.0  ;;  %v221_v17 = vmin.f32 %v219_v13, 15.0  ;;  %v224_v18 = vmax.f32 %v222_v14, 0.0  ;;  %v225_v19 = vmax.f32 %v223_v15, 0.0 }
  0x4f   : > { %v264_v20 = vsub.f32 %v214_v8, %v220_v16  ;;  %v1274_v21 = vtrunc.f32 %v220_v16  ;;  %v1276_v22 = vtrunc.f32 %v221_v17  ;;  %v226_v23 = vmin.f32 %v224_v18, 15.0 }
  0x50   : > { %v227_v24 = vmin.f32 %v225_v19, 15.0  ;;  %v265_v32 = vsub.f32 %v215_v9, %v221_v17 }
  0x51   : > { %310 = vperm.xlu1 %1399, %v264_v20   ;;  %v1275_v25 = vcvt.f32.s32 %v1274_v21  ;;  %v1277_v26 = vcvt.f32.s32 %v1276_v22  ;;  %v1278_v27 = vtrunc.f32 %v226_v23  ;;  %v242_v30 = vsub.f32 %v226_v23, %v214_v8 }
  0x52   : > { %v1280_v29 = vtrunc.f32 %v227_v24  ;;  %v243_v33 = vsub.f32 %v227_v24, %v215_v9  ;;  %v438_v9 = vunpack.c.0.s8 %v437_v2 }
  0x53   : > { %284 = vperm.xlu0 %1400, %v1275_v25   ;;  %v1279_v28 = vcvt.f32.s32 %v1278_v27 }
  0x54   : > { %v1281_v31 = vcvt.f32.s32 %v1280_v29  ;;  %v441_v15 = vsub.s32 %v438_v9, %v1760_v42 }
  0x55   : > { %287 = vperm.xlu1 %1399, %v1277_v26  }
  0x57   : > { %302 = vperm.xlu0 %1400, %v1279_v28  }
  0x59   : > { %292 = vperm.xlu1 %1399, %v242_v30  }
  0x5b   : > { %305 = vperm.xlu0 %1400, %v1281_v31  }
  0x5d   : > { %314 = vperm.xlu1 %1399, %v265_v32  }
  0x5f   : > { %296 = vperm.xlu0 %1400, %v243_v33  }
  0x61   : > { %1402 = vset.pattern.permute.xlu1 %v1594_v34 }
  0x62   : > { %257 = vperm.xlu1 %1402, %v1279_v28  }
  0x63   : > { %1401 = vset.pattern.permute.xlu0 %v1594_v34 }
  0x64   : > { %235 = vperm.xlu0 %1401, %v1275_v25  }
  0x66   : > { %238 = vperm.xlu1 %1402, %v1277_v26  }
  0x68   : > { %246 = vperm.xlu0 %1401, %v242_v30  }
  0x6a   : > { %260 = vperm.xlu1 %1402, %v1281_v31  }
  0x6c   : > { %268 = vperm.xlu0 %1401, %v264_v20  }
  0x6e   : > { %251 = vperm.xlu1 %1402, %v243_v33  }
  0x70   : > { %273 = vperm.xlu0 %1401, %v265_v32  }
  0x74   : > { %1438 = vset.pattern.permute.xlu0 %v1593_v3 }
  0xcc   : > { %v311_v36 = vpop.permute.xlu1 %310 }
  0xce   : > { %v285_v39 = vpop.permute.xlu0 %284 }
  0xcf   : > { %vm289_vm1 = vcmp.eq.s32.totalorder %v282_v40, %v285_v39 }
  0xd0   : > { %v288_v41 = vpop.permute.xlu1 %287 }
  0xd1   : > { %vm290_vm2 = vcmp.eq.s32.totalorder %v282_v40, %v288_v41 }
  0xd2   : > { %v303_v43 = vpop.permute.xlu0 %302 }
  0xd3   : > { %vm307_vm0 = vcmp.eq.s32.totalorder %v282_v40, %v303_v43 }
  0xd4   : > { %v317_v44 = vsel %vm307_vm0, %v311_v36, 0.0  ;;  %v293_v45 = vpop.permute.xlu1 %292 }
  0xd5   : > { %v299_v48 = vsel %vm289_vm1, %v293_v45, 0.0 }
  0xd6   : > { %v319_v49 = vadd.f32 %v317_v44, %v299_v48  ;;  %v306_v50 = vpop.permute.xlu0 %305 }
  0xd7   : > { %vm308_vm3 = vcmp.eq.s32.totalorder %v282_v40, %v306_v50 }
  0xd8   : > { %v331_v51 = vrot.slane %v319_v49, %v330_v47  ;;  %v324_v52 = vrot.slane %v319_v49, %v1763_v46  ;;  %v315_v55 = vpop.permute.xlu1 %314  ;;  %v345_v58 = vrot.slane %v319_v49, %v344_v53  ;;  %v338_v59 = vrot.slane %v319_v49, %v337_v54 }
  0xd9   : > { %v359_v3 = vrot.slane %v319_v49, %v358_v57  ;;  %v352_v4 = vrot.slane %v319_v49, %v351_v60  ;;  %v318_v7 = vsel %vm308_vm3, %v315_v55, 0.0  ;;  %v373_v11 = vrot.slane %v319_v49, %v372_v62 }
  0xda   : > { %333 = vbcast.lane.b32.xlu0 %v331_v51, 256  ;;  %326 = vbcast.lane.b32.xlu1 %v324_v52, 256  ;;  %v297_v56 = vpop.permute.xlu0 %296  ;;  %v366_v12 = vrot.slane %v319_v49, %v365_v63 }
  0xdb   : > { %v300_v5 = vsel %vm290_vm2, %v297_v56, 0.0 }
  0xdc   : > { %v320_v10 = vadd.f32 %v318_v7, %v300_v5 }
  0xdd   : > { %v258_v61 = vpop.permute.xlu1 %257 }
  0xde   : > { %347 = vbcast.lane.b32.xlu0 %v345_v58, 256  ;;  %340 = vbcast.lane.b32.xlu1 %v338_v59, 256  ;;  %vm262_vm5 = vcmp.eq.s32.totalorder %v1757_v37, %v258_v61  ;;  %v387_v17 = vrot.slane %v320_v10, %v330_v47  ;;  %v380_v18 = vrot.slane %v320_v10, %v1763_v46 }
  0xdf   : > { %v236_v0 = vpop.permute.xlu0 %235  ;;  %v401_v26 = vrot.slane %v320_v10, %v344_v53  ;;  %v394_v27 = vrot.slane %v320_v10, %v337_v54  ;;  %v415_v33 = vrot.slane %v320_v10, %v358_v57  ;;  %v408_v34 = vrot.slane %v320_v10, %v351_v60 }
  0xe0   : > { %vm240_vm4 = vcmp.eq.s32.totalorder %v1757_v37, %v236_v0  ;;  %v429_v35 = vrot.slane %v320_v10, %v372_v62  ;;  %v422_v40 = vrot.slane %v320_v10, %v365_v63 }
  0xe1   : > { %v239_v6 = vpop.permute.xlu1 %238 }
  0xe2   : > { %361 = vbcast.lane.b32.xlu0 %v359_v3, 256  ;;  %354 = vbcast.lane.b32.xlu1 %v352_v4, 256  ;;  %vm241_vm6 = vcmp.eq.s32.totalorder %v1757_v37, %v239_v6 }
  0xe3   : > { %v247_v8 = vpop.permute.xlu0 %246 }
  0xe4   : > { %v254_v14 = vsel %vm240_vm4, %v247_v8, 0.0 }
  0xe5   : > { %v261_v13 = vpop.permute.xlu1 %260 }
  0xe6   : > { %375 = vbcast.lane.b32.xlu0 %v373_v11, 256  ;;  %368 = vbcast.lane.b32.xlu1 %v366_v12, 256  ;;  %vm263_vm7 = vcmp.eq.s32.totalorder %v1757_v37, %v261_v13  ;;  %v993_v12 = vld [vmem:[%s1739_s17 + $0x78] sm:$0xff]  ;;  %v992_v13 = vld [vmem:[%s1739_s17 + $0x70] sm:$0xff] }
  0xe7   : > { %v269_v16 = vpop.permute.xlu0 %268  ;;  %1239 = vmatprep.subr.mxu0 %v993_v12 }
  0xe8   : > { %v276_v19 = vsel %vm262_vm5, %v269_v16, 0.0  ;;  %1240 = vmatpush3.msra.mxu0 %v993_v12  ;;  %v989_v16 = vld [vmem:[%s1739_s17 + $0x58] sm:$0xff] }
  0xe9   : > { %v278_v20 = vadd.f32 %v276_v19, %v254_v14  ;;  %v252_v21 = vpop.permute.xlu1 %251  ;;  %v991_v14 = vld [vmem:[%s1739_s17 + $0x68] sm:$0xff]  ;;  %1241 = vmatprep.subr.mxu0 %v992_v13  ;;  %v986_v19 = vld [vmem:[%s1739_s17 + $0x40] sm:$0xff] }
  0xea   : > { %389 = vbcast.lane.b32.xlu0 %v387_v17, 256  ;;  %382 = vbcast.lane.b32.xlu1 %v380_v18, 256  ;;  %v255_v22 = vsel %vm241_vm6, %v252_v21, 0.0  ;;  %v988_v17 = vld [vmem:[%s1739_s17 + $0x50] sm:$0xff]  ;;  %v987_v18 = vld [vmem:[%s1739_s17 + $0x48] sm:$0xff] }
  0xeb   : > { %v435_v23 = vcombine.high %v278_v20, %v278_v20  ;;  %v442_v24 = vrot.slane %v278_v20, %v441_v15  ;;  %v274_v25 = vpop.permute.xlu0 %273  ;;  %1242 = vmatpush3.msra.mxu0 %v992_v13  ;;  %v1596_v20 = vmov 1983009808  }
  0xec   : > { %v277_v28 = vsel %vm263_vm7, %v274_v25, 0.0  ;;  %1243 = vmatprep.subr.mxu0 %v991_v14  ;;  %v632_v21 = vunpack.c.l.s4 %v1596_v20 }
  0xed   : > { %v449_v29 = vrot.slane %v435_v23, %v441_v15  ;;  %v450_v30 = vcombine.high %v442_v24, %v442_v24  ;;  %v279_v31 = vadd.f32 %v277_v28, %v255_v22  ;;  %v1779_v32 = vrot.slane %v442_v24, %v441_v15  ;;  %1244 = vmatpush3.msra.mxu0 %v991_v14 }
  0xee   : > { %403 = vbcast.lane.b32.xlu0 %v401_v26, 256  ;;  %396 = vbcast.lane.b32.xlu1 %v394_v27, 256  ;;  %v633_v22 = vunpack.c.0.s8 %v632_v21  ;;  %v1597_v23 = vmov 1934713408  }
  0xef   : > { %v484_v36 = vcombine.high %v279_v31, %v279_v31  ;;  %v491_v37 = vrot.slane %v279_v31, %v441_v15  ;;  %v536_v38 = vrot.slane %v1779_v32, %v1763_v46  ;;  %v1783_v39 = vrot.slane %v450_v30, %v441_v15 }
  0xf0   : > { %v480_v41 = vcombine.high %v1779_v32, %v1779_v32  ;;  %v1787_v43 = vrot.slane %v449_v29, %v441_v15  ;;  %v451_v44 = vcombine.high %v449_v29, %v449_v29  ;;  %v696_v24 = vunpack.c.l.s4 %v1597_v23 }
  0xf1   : > { %v498_v45 = vrot.slane %v484_v36, %v441_v15  ;;  %v499_v47 = vcombine.high %v491_v37, %v491_v37  ;;  %v540_v48 = vrot.slane %v1783_v39, %v1763_v46  ;;  %v482_v49 = vcombine.high %v1783_v39, %v1783_v39 }
  0xf2   : > { %417 = vbcast.lane.b32.xlu0 %v415_v33, 256  ;;  %410 = vbcast.lane.b32.xlu1 %v408_v34, 256  ;;  %v1794_v50 = vrot.slane %v480_v41, %v1763_v46  ;;  %v552_v51 = vrot.slane %v1787_v43, %v1763_v46  ;;  %v1798_v52 = vrot.slane %v451_v44, %v441_v15  ;;  %v697_v28 = vunpack.c.0.s8 %v696_v24 }
  0xf3   : > { %v1801_v53 = vrot.slane %v482_v49, %v1763_v46  ;;  %v481_v54 = vcombine.high %v1787_v43, %v1787_v43  ;;  %v1805_v55 = vrot.slane %v491_v37, %v441_v15  ;;  %v1807_v56 = vrot.slane %v499_v47, %v441_v15 }
  0xf4   : > { %v556_v57 = vrot.slane %v1798_v52, %v1763_v46  ;;  %v483_v58 = vcombine.high %v1798_v52, %v1798_v52  ;;  %v1813_v59 = vrot.slane %v498_v45, %v441_v15  ;;  %v500_v60 = vcombine.high %v498_v45, %v498_v45 }
  0xf5   : > { %v1816_v61 = vrot.slane %v481_v54, %v1763_v46  ;;  %v568_v62 = vrot.slane %v1805_v55, %v1763_v46  ;;  %v572_v63 = vrot.slane %v1807_v56, %v1763_v46  ;;  %v529_v0 = vcombine.high %v1805_v55, %v1805_v55 }
  0xf6   : > { %431 = vbcast.lane.b32.xlu0 %v429_v35, 256  ;;  %424 = vbcast.lane.b32.xlu1 %v422_v40, 256  ;;  %v1825_v1 = vrot.slane %v483_v58, %v1763_v46  ;;  %v531_v2 = vcombine.high %v1807_v56, %v1807_v56  ;;  %v584_v3 = vrot.slane %v1813_v59, %v1763_v46 }
  0xf7   : > { %v1832_v4 = vrot.slane %v529_v0, %v1763_v46  ;;  %v1834_v5 = vrot.slane %v500_v60, %v441_v15  ;;  %v530_v6 = vcombine.high %v1813_v59, %v1813_v59  ;;  %v990_v15 = vld [vmem:[%s1739_s17 + $0x60] sm:$0xff]  ;;  %v1860_v27 = vsub.s32 %v633_v22, %v1760_v42 }
  0xf8   : > { %v1839_v7 = vrot.slane %v531_v2, %v1763_v46  ;;  %1245 = vmatprep.subr.mxu0 %v990_v15  ;;  %v1871_v44 = vsub.s32 %v697_v28, %v1760_v42 }
  0xf9   : > { %v588_v8 = vrot.slane %v1834_v5, %v1763_v46  ;;  %v1844_v9 = vrot.slane %v530_v6, %v1763_v46  ;;  %v532_v10 = vcombine.high %v1834_v5, %v1834_v5  ;;  %1246 = vmatpush3.msra.mxu0 %v990_v15 }
  0xfa   : > { %1247 = vmatprep.subr.mxu0 %v989_v16 }
  0xfb   : > { %v1849_v11 = vrot.slane %v532_v10, %v1763_v46  ;;  %1248 = vmatpush3.msra.mxu0 %v989_v16 }
  0xfc   : > { %1249 = vmatprep.subr.mxu0 %v988_v17 }
  0xfd   : > { %1250 = vmatpush3.msra.mxu0 %v988_v17 }
  0xfe   : > { %1251 = vmatprep.subr.mxu0 %v987_v18 }
  0xff   : > { %1252 = vmatpush3.msra.mxu0 %v987_v18 }
 0x100   : > { %1253 = vmatprep.subr.mxu0 %v986_v19 }
 0x101   : > { %1254 = vmatpush3.msra.mxu0 %v986_v19 }
 0x14c   : > { %v327_v25 = vpop.permute.xlu1 %326  ;;  %v334_v26 = vpop.permute.xlu0 %333 }
 0x14d   : > { %v613_v31 = vmul.f32 %v536_v38, %v327_v25  ;;  %v614_v33 = vmul.f32 %v540_v48, %v334_v26 }
 0x150   : > { %v341_v29 = vpop.permute.xlu1 %340  ;;  %v348_v30 = vpop.permute.xlu0 %347 }
 0x151   : > { %v615_v34 = vmul.f32 %v1794_v50, %v341_v29  ;;  %v616_v35 = vmul.f32 %v1801_v53, %v348_v30 }
 0x153   : > { %v629_v36 = vcombine.low %v613_v31, %v615_v34  ;;  %v630_v37 = vcombine.high %v613_v31, %v615_v34  ;;  %v645_v40 = vcombine.low %v614_v33, %v616_v35  ;;  %v646_v41 = vcombine.high %v614_v33, %v616_v35 }
 0x154   : > { %v355_v45 = vpop.permute.xlu1 %354  ;;  %v362_v47 = vpop.permute.xlu0 %361 }
 0x155   : > { %v637_v32 = vrot.slane %v629_v36, %v1860_v27  ;;  %v644_v38 = vrot.slane %v630_v37, %v1860_v27  ;;  %v653_v39 = vrot.slane %v645_v40, %v1860_v27  ;;  %v660_v48 = vrot.slane %v646_v41, %v1860_v27 }
 0x156   : > { %v617_v58 = vmul.f32 %v552_v51, %v355_v45  ;;  %v618_v42 = vmul.f32 %v556_v57, %v362_v47 }
 0x157   : > { %v693_v49 = vcombine.low %v637_v32, %v653_v39  ;;  %v694_v50 = vcombine.high %v637_v32, %v653_v39  ;;  %v709_v53 = vcombine.low %v644_v38, %v660_v48  ;;  %v710_v54 = vcombine.high %v644_v38, %v660_v48 }
 0x158   : > { %v369_v60 = vpop.permute.xlu1 %368  ;;  %v376_v0 = vpop.permute.xlu0 %375 }
 0x159   : > { %v619_v2 = vmul.f32 %v1816_v61, %v369_v60  ;;  %v620_v6 = vmul.f32 %v1825_v1, %v376_v0  ;;  %v1886_v10 = vrot.slane %v694_v50, %v1871_v44  ;;  %v1889_v12 = vrot.slane %v693_v49, %v1871_v44 }
 0x15a   : > { %v1892_v13 = vrot.slane %v709_v53, %v1871_v44  ;;  %v1895_v43 = vrot.slane %v710_v54, %v1871_v44 }
 0x15b   : > { %v661_v51 = vcombine.low %v617_v58, %v619_v2  ;;  %v662_v52 = vcombine.high %v617_v58, %v619_v2  ;;  %v677_v57 = vcombine.low %v618_v42, %v620_v6  ;;  %v678_v14 = vcombine.high %v618_v42, %v620_v6 }
 0x15c   : > { %v383_v15 = vpop.permute.xlu1 %382  ;;  %v390_v61 = vpop.permute.xlu0 %389 }
 0x15d   : > { %v669_v1 = vrot.slane %v661_v51, %v1860_v27  ;;  %v676_v16 = vrot.slane %v662_v52, %v1860_v27  ;;  %v685_v17 = vrot.slane %v677_v57, %v1860_v27  ;;  %v692_v18 = vrot.slane %v678_v14, %v1860_v27  ;;  %v984_v14 = vld [vmem:[%s1739_s17 + $0x30] sm:$0xff] }
 0x15e   : > { %v621_v23 = vmul.f32 %v568_v62, %v383_v15  ;;  %v622_v24 = vmul.f32 %v572_v63, %v390_v61 }
 0x15f   : > { %v725_v19 = vcombine.low %v669_v1, %v685_v17  ;;  %v726_v20 = vcombine.high %v669_v1, %v685_v17  ;;  %v741_v21 = vcombine.low %v676_v16, %v692_v18  ;;  %v742_v22 = vcombine.high %v676_v16, %v692_v18 }
 0x160   : > { %v397_v25 = vpop.permute.xlu1 %396  ;;  %v404_v26 = vpop.permute.xlu0 %403 }
 0x161   : > { %v623_v28 = vmul.f32 %v1832_v4, %v397_v25  ;;  %v624_v29 = vmul.f32 %v1839_v7, %v404_v26  ;;  %v1910_v30 = vrot.slane %v726_v20, %v1871_v44  ;;  %v1913_v31 = vrot.slane %v725_v19, %v1871_v44  ;;  %v983_v19 = vld [vmem:[%s1739_s17 + $0x28] sm:$0xff]  ;;  %v982_v20 = vld [vmem:[%s1739_s17 + $0x20] sm:$0xff] }
 0x162   : > { %v1916_v33 = vrot.slane %v741_v21, %v1871_v44  ;;  %v1919_v55 = vrot.slane %v742_v22, %v1871_v44 }
 0x163   : > { %v765_v56 = vcombine.low %v621_v23, %v623_v28  ;;  %v766_v62 = vcombine.high %v621_v23, %v623_v28  ;;  %v781_v63 = vcombine.low %v622_v24, %v624_v29  ;;  %v782_v34 = vcombine.high %v622_v24, %v624_v29 }
 0x164   : > { %v411_v35 = vpop.permute.xlu1 %410  ;;  %v418_v4 = vpop.permute.xlu0 %417  ;;  %v759_v7 = vcombine.low %v1886_v10, %v1910_v30  ;;  %v757_v36 = vcombine.low %v1889_v12, %v1913_v31  ;;  %v758_v37 = vcombine.high %v1889_v12, %v1913_v31  ;;  %v761_v40 = vcombine.low %v1892_v13, %v1916_v33 }
 0x165   : > { %v773_v41 = vrot.slane %v765_v56, %v1860_v27  ;;  %v780_v45 = vrot.slane %v766_v62, %v1860_v27  ;;  %v789_v47 = vrot.slane %v781_v63, %v1860_v27  ;;  %v796_v32 = vrot.slane %v782_v34, %v1860_v27 }
 0x166   : > { %v760_v38 = vcombine.high %v1886_v10, %v1910_v30  ;;  %v763_v39 = vcombine.low %v1895_v43, %v1919_v55  ;;  %v625_v54 = vmul.f32 %v584_v3, %v411_v35  ;;  %v626_v58 = vmul.f32 %v588_v8, %v418_v4  ;;  %v980_v35 = vld [vmem:[%s1739_s17 + $0x10] sm:$0xff]  ;;  %v978_v10 = vld [vmem:[%s1739_s17] sm:$0xff] }
 0x167   : > { %v829_v48 = vcombine.low %v773_v41, %v789_v47  ;;  %v830_v49 = vcombine.high %v773_v41, %v789_v47  ;;  %v845_v50 = vcombine.low %v780_v45, %v796_v32  ;;  %v846_v53 = vcombine.high %v780_v45, %v796_v32  ;;  %v979_v32 = vld [vmem:[%s1739_s17 + $0x8] sm:$0xff] }
 0x168   : > { %v425_v42 = vpop.permute.xlu1 %424  ;;  %v432_v60 = vpop.permute.xlu0 %431  ;;  %v762_v0 = vcombine.high %v1892_v13, %v1916_v33  ;;  %v764_v2 = vcombine.high %v1895_v43, %v1919_v55  ;;  %v985_v43 = vld [vmem:[%s1739_s17 + $0x38] sm:$0xff] }
 0x169   : > { %v627_v6 = vmul.f32 %v1844_v9, %v425_v42  ;;  %v628_v51 = vmul.f32 %v1849_v11, %v432_v60  ;;  %v844_v59 = vrot.slane %v830_v49, %v1871_v44  ;;  %v1951_v3 = vrot.slane %v829_v48, %v1871_v44  ;;  %1255 = vmatprep.subr.mxu0 %v985_v43 }
 0x16a   : > { %v853_v46 = vrot.slane %v845_v50, %v1871_v44  ;;  %v860_v5 = vrot.slane %v846_v53, %v1871_v44  ;;  %1256 = vmatpush3.msra.mxu0 %v985_v43 }
 0x16b   : > { %v797_v8 = vcombine.low %v625_v54, %v627_v6  ;;  %v798_v52 = vcombine.high %v625_v54, %v627_v6  ;;  %v813_v57 = vcombine.low %v626_v58, %v628_v51  ;;  %v814_v13 = vcombine.high %v626_v58, %v628_v51  ;;  %1257 = vmatprep.subr.mxu0 %v984_v14 }
 0x16c   : > { %1258 = vmatpush3.msra.mxu0 %v984_v14 }
 0x16d   : > { %v805_v9 = vrot.slane %v797_v8, %v1860_v27  ;;  %v812_v11 = vrot.slane %v798_v52, %v1860_v27  ;;  %v821_v15 = vrot.slane %v813_v57, %v1860_v27  ;;  %v828_v61 = vrot.slane %v814_v13, %v1860_v27  ;;  %1259 = vmatprep.subr.mxu0 %v983_v19  ;;  %v981_v27 = vld [vmem:[%s1739_s17 + $0x18] sm:$0xff] }
 0x16e   : > { %1260 = vmatpush3.msra.mxu0 %v983_v19 }
 0x16f   : > { %v861_v1 = vcombine.low %v805_v9, %v821_v15  ;;  %v862_v16 = vcombine.high %v805_v9, %v821_v15  ;;  %v877_v17 = vcombine.low %v812_v11, %v828_v61  ;;  %v878_v18 = vcombine.high %v812_v11, %v828_v61  ;;  %1261 = vmatprep.subr.mxu0 %v982_v20 }
 0x170   : > { %1262 = vmatpush3.msra.mxu0 %v982_v20 }
 0x171   : > { %v876_v21 = vrot.slane %v862_v16, %v1871_v44  ;;  %v869_v22 = vrot.slane %v861_v1, %v1871_v44  ;;  %v885_v23 = vrot.slane %v877_v17, %v1871_v44  ;;  %v892_v24 = vrot.slane %v878_v18, %v1871_v44  ;;  %1263 = vmatprep.subr.mxu0 %v981_v27  ;;  %v995_v1 = vld [vmem:[#allocation2 + $0x8] sm:$0xff]  ;;  %v994_v17 = vld [vmem:[#allocation2] sm:$0xff] }
 0x172   : > { %1264 = vmatpush3.msra.mxu0 %v981_v27 }
 0x173   : > { %v895_v25 = vcombine.low %v844_v59, %v876_v21  ;;  %v894_v26 = vcombine.high %v1951_v3, %v869_v22  ;;  %v893_v28 = vcombine.low %v1951_v3, %v869_v22  ;;  %v897_v29 = vcombine.low %v853_v46, %v885_v23  ;;  %1265 = vmatprep.subr.mxu0 %v980_v35 }
 0x174   : > { %v896_v33 = vcombine.high %v844_v59, %v876_v21  ;;  %v899_v55 = vcombine.low %v860_v5, %v892_v24  ;;  %v898_v56 = vcombine.high %v853_v46, %v885_v23  ;;  %v900_v62 = vcombine.high %v860_v5, %v892_v24  ;;  %1266 = vmatpush3.msra.mxu0 %v980_v35 }
 0x175   : > { %v1408_v44 = vpack.i.bf16 %v895_v25, %v759_v7  ;;  %v1403_v63 = vpack.i.bf16 %v894_v26, %v758_v37  ;;  %v1418_v34 = vpack.i.bf16 %v897_v29, %v761_v40  ;;  %1267 = vmatprep.subr.mxu0 %v979_v32 }
 0x176   : > { %v1413_v4 = vpack.i.bf16 %v896_v33, %v760_v38  ;;  %v1428_v41 = vpack.i.bf16 %v899_v55, %v763_v39  ;;  %v1423_v45 = vpack.i.bf16 %v898_v56, %v762_v0  ;;  %v1433_v47 = vpack.i.bf16 %v900_v62, %v764_v2  ;;  %1268 = vmatpush3.msra.mxu0 %v979_v32 }
 0x177   : > { %1409 = vrot.lane.b32.xlu0 %v1408_v44, %s1598_s26  ;;  %1404 = vrot.lane.b32.xlu1 %v1403_v63, %s1599_s20 }
 0x178   : > { %1269 = vmatprep.subr.mxu0 %v978_v10 }
 0x179   : > { %1270 = vmatpush3.msra.mxu0 %v978_v10 }
 0x17b   : > { %1419 = vrot.lane.b32.xlu0 %v1418_v34, %s1600_s23  ;;  %1414 = vrot.lane.b32.xlu1 %v1413_v4, %s1601_s7 }
 0x17f   : > { %1429 = vrot.lane.b32.xlu0 %v1428_v41, %s1602_s25  ;;  %1424 = vrot.lane.b32.xlu1 %v1423_v45, %s1603_s30 }
 0x183   : > { %1434 = vrot.lane.b32.xlu1 %v1433_v47, %s1604_s5 }
 0x1e9   : > { %v1410_v30 = vpop.permute.xlu0 %1409  ;;  %v1405_v7 = vpop.permute.xlu1 %1404 }
 0x1ea   : > { %v1407_v37 = vunpack.i.h.bf16 %v1405_v7  ;;  %v1406_v40 = vunpack.i.l.bf16 %v1405_v7  ;;  %v1412_v38 = vunpack.i.h.bf16 %v1410_v30  ;;  %v1411_v39 = vunpack.i.l.bf16 %v1410_v30 }
 0x1ec   : > { %v958_v48 = vsel %vm957_vm8, %v757_v36, %v1406_v40  ;;  %v959_v49 = vsel %vm957_vm8, %v893_v28, %v1407_v37 }
 0x1ed   : > { %v1420_v50 = vpop.permute.xlu0 %1419  ;;  %v1415_v53 = vpop.permute.xlu1 %1414  ;;  %v961_v0 = vsel %vm960_vm9, %v958_v48, %v1411_v39  ;;  %v962_v2 = vsel %vm960_vm9, %v959_v49, %v1412_v38 }
 0x1ee   : > { %v1417_v54 = vunpack.i.h.bf16 %v1415_v53  ;;  %v1416_v58 = vunpack.i.l.bf16 %v1415_v53  ;;  %v1422_v42 = vunpack.i.h.bf16 %v1420_v50  ;;  %v1421_v60 = vunpack.i.l.bf16 %v1420_v50 }
 0x1f0   : > { %v964_v6 = vsel %vm963_vm10, %v961_v0, %v1416_v58  ;;  %v965_v51 = vsel %vm963_vm10, %v962_v2, %v1417_v54 }
 0x1f1   : > { %v1430_v59 = vpop.permute.xlu0 %1429  ;;  %v1425_v3 = vpop.permute.xlu1 %1424  ;;  %v967_v5 = vsel %vm966_vm11, %v964_v6, %v1421_v60  ;;  %v968_v8 = vsel %vm966_vm11, %v965_v51, %v1422_v42 }
 0x1f2   : > { %v1427_v46 = vunpack.i.h.bf16 %v1425_v3  ;;  %v1426_v12 = vunpack.i.l.bf16 %v1425_v3  ;;  %v1432_v31 = vunpack.i.h.bf16 %v1430_v59  ;;  %v1431_v36 = vunpack.i.l.bf16 %v1430_v59 }
 0x1f4   : > { %v970_v52 = vsel %vm969_vm12, %v967_v5, %v1426_v12  ;;  %v971_v57 = vsel %vm969_vm12, %v968_v8, %v1427_v46 }
 0x1f5   : > { %v1435_v13 = vpop.permute.xlu1 %1434  ;;  %v973_v9 = vsel %vm972_vm13, %v970_v52, %v1431_v36  ;;  %v974_v11 = vsel %vm972_vm13, %v971_v57, %v1432_v31 }
 0x1f6   : > { %v1437_v43 = vunpack.i.h.bf16 %v1435_v13  ;;  %v1436_v14 = vunpack.i.l.bf16 %v1435_v13 }
 0x1f8   : > { %v976_v15 = vsel %vm975_vm14, %v973_v9, %v1436_v14  ;;  %v977_v61 = vsel %vm975_vm14, %v974_v11, %v1437_v43 }
 0x1f9   : > { %1271 = vmatprep.mubr.f32.mxu0 %v976_v15 }
 0x1fa   : > { %1272 = vmatmul.mubr.f32.vlgmr.msra.gmra.mxu0 %v977_v61 }
 0x2ba   : > { %v1273_v16 = vpop.f32.mrf.mxu0 }
 0x2bb   : > { %v1072_v18 = vadd.f32 %v1273_v16, %v995_v1  ;;  %1078 = sbr.rel (%p1212_p7) target bundleno = 712 (0x2c8), region = 40 }
 0x2bc   : > { %v1062_v19 = vpop.f32.mrf.mxu0 }
 0x2bd   : > { %1074 = vst [vmem:[#allocation2 + $0x8] sm:$0xff] %v1072_v18  ;;  %v1071_v20 = vadd.f32 %v1062_v19, %v994_v17 }
 0x2bf   : > { %1073 = vst [vmem:[#allocation2] sm:$0xff] %v1071_v20 }
 0x2c4   : > { %v1080_v22 = vld [vmem:[#allocation2 + $0x8] sm:$0xff] }
 0x2c5   : > { %1082 = vst [vmem:[%s1753_s12 + $0x8] sm:$0xff] %v1080_v22 }
 0x2c6   : > { %v1079_v21 = vld [vmem:[#allocation2] sm:$0xff] }
 0x2c7   : > { %1081 = vst [vmem:[%s1753_s12] sm:$0xff] %v1079_v21 }
 0x2c8 PF: > { %s1220_s17 = sshll.u32 %s1575_s16, 8  ;;  %s1098_s27 = sshll.u32 %s1753_s12, 4  ;;  %s1099_s27 = int_to_ptr.vmem [resolvable:$true] %s1098_s27 }
 0x2c9   : > { %s1096_s21 = scalar_lea.hbm %s2040_s2, %s1220_s17  ;;  %s1084_s15 = scalar_lea.sflag [#allocation5], %s191_s22 }
 0x2ca   : > { %s1467_s8 = scalar_lea.vmem %s1099_s27, 256  ;;  %s1605_s28 = smov [#allocation6]  }
 0x2cb   : > { %p1468_p8 = scmp.ne.s32.totalorder %s1099_s27, %s1467_s8  ;;  %s1471_s26 = sshll.u32 %s1605_s28, 4  ;;  %s1472_s26 = int_to_ptr.vmem [resolvable:$false] %s1471_s26 }
 0x2cc   : > { %s1473_s20 = scalar_lea.vmem %s1472_s26, 512  ;;  %p1474_p10 = scmp.lt.s32.totalorder %s1099_s27, %s1472_s26 }
 0x2cd   : > { %p1469_p9 = pnand %p1468_p8, %p1703_p12  ;;  %p1475_p11 = scmp.lt.s32.totalorder %s1473_s20, %s1467_s8 }
 0x2cf   : > { %p1470_p3 = pneg %p1469_p9  ;;  %p1476_p13 = por %p1475_p11, %p1474_p10 }
 0x2d1   : > { %p1477_p0 = pnand %p1476_p13, %p1470_p3 }
 0x2d3   : > { %1480 = shalt.err (!%p1477_p0)
}
 0x2d4   : > { %s1481_s16 = scalar_lea.hbm %s1096_s21, 256  ;;  %s1485_s23 = scalar_lea.hbm %s2040_s2, 512 }
 0x2d5   : > { %p1482_p1 = scmp.ne.s32.totalorder %s1096_s21, %s1481_s16  ;;  %p1486_p6 = scmp.lt.s32.totalorder %s1096_s21, %s2040_s2 }
 0x2d6   : > { %p1487_p7 = scmp.lt.s32.totalorder %s1485_s23, %s1481_s16 }
 0x2d7   : > { %p1483_p5 = pnand %p1482_p1, %p1703_p12 }
 0x2d8   : > { %p1488_p8 = por %p1487_p7, %p1486_p6 }
 0x2d9   : > { %p1484_p4 = pneg %p1483_p5 }
 0x2db   : > { %p1489_p9 = pnand %p1488_p8, %p1484_p4 }
 0x2dd   : > { %1492 = shalt.err (!%p1489_p9)
}
 0x2de   : > { %1284 = dma.vmem_to_hbm [thread:$0]  (%p1703_p12), %s1099_s27, 256, %s1096_s21, %s1084_s15  }
 0x2df PF: > { %p1295_p3 = scmp.ge.s32.totalorder %s1587_s19, 2  ;;  %s1110_s30 = sand.u32 1, %s1547_s9  }
 0x2e0   : > { %s1111_s5 = scalar_lea.sflag [#allocation5], %s1110_s30 }
 0x2e1   : > { %p1291_p10 = pnand %p1295_p3, %p1716_p2 }
 0x2e3   : > { %p1292_p11 = pneg %p1291_p10 }
 0x2e5   : > { %1542 = dma.done.wait (%p1292_p11), %s1111_s5, 256  }
 0x2e6   : > { %1544 = vsyncadd (%p1292_p11), %s1111_s5, 4294967040  ;;  %s18_s19 = sadd.s32 1, %s1587_s19   ;;  %s2053_s3 = sld [smem:[#allocation12_spill]] }
 0x2e7   : > { %p15_p13 = scmp.ge.s32.totalorder %s18_s19, 6   ;;  %s2054_s15 = sld [smem:[#allocation9_spill]] }
 0x2e8   : > { %s2055_s17 = sld [smem:[#allocation10_spill]]  ;;  %s2057_s9 = smov %s1551_s10 }
 0x2e9   : > { %s2056_s29 = sld [smem:[#allocation11_spill]]  ;;  %s2058_s10 = smov %s1555_s11 }
 0x2ea   : > { %s2059_s11 = smov %s1708_s4  ;;  %s2060_s12 = smov %s1563_s13 }
 0x2eb   : > { %s2061_s13 = smov %s1567_s14  ;;  %s2063_s16 = smov %s1583_s18 }
 0x2ec   : > { %s2062_s14 = smov %s2053_s3  ;;  %17 = sbr.rel (!%p15_p13) target bundleno = 9 (0x9), region = 84 }
 0x2ef   : > { %s2064_s18 = smov %s2056_s29 }
 0x2f1   :  { %1116 = vsyncpa [#allocation4], 1 }
 0x2f2   :  { %1118 = vsyncpa [#allocation4 + $0x1], 1 }
 0x2f3   :  { %1119 = vsyncpa [#allocation5], 1 }
 0x2f4   :  { %1121 = vsyncpa [#allocation5 + $0x1], 1 }

</bundles_post_ra>
